<compile_context>
chip_gen: v5e
topology: v5e:2x2
jax: 0.10.0
libtpu: 0.0.40
codegen_flags: <defaults>
</compile_context>

<pallas_src>
import jax
import jax.numpy as jnp
from jax.experimental import pallas as pl
from jax.experimental.pallas import tpu as pltpu


def _dynamic_weight_kernel(w_ref, l_ref, o_ref):
    # w_ref, l_ref: (1, num_tasks) f32 in VMEM (full-array blocks, < 1 vreg).
    # o_ref       : (1, 1) f32 scalar in SMEM.
    # Inputs stay in VMEM (not SMEM) because exp / lane-reduce need the vector
    # path; for 24 bytes the tile DMA is still the cheapest safe option.
    w = w_ref[...]  # (1, N) f32
    l = l_ref[...]  # (1, N) f32

    # numerically stabilized softmax-weighted sum: sum(e * l) / sum(e)
    m = jnp.max(w, axis=-1, keepdims=True)
    e = jnp.exp(w - m)                                         # EUP
    num = jnp.sum(e * l, axis=-1, keepdims=True)               # VPU mul + XLU reduce
    inv_den = pl.reciprocal(jnp.sum(e, axis=-1, keepdims=True),
                            approx=True)                       # EUP (idle slot)
    o_ref[0, 0] = (num * inv_den)[0, 0]                        # scalar -> SMEM


def _forward_impl(weights, losses):
    num_tasks = weights.shape[0]
    # reshape to (1, N) is metadata-only; no wrapper-side concatenate/copy.
    w2 = weights.reshape(1, num_tasks).astype(jnp.float32)
    l2 = losses.reshape(1, num_tasks).astype(jnp.float32)

    out = pl.pallas_call(
        _dynamic_weight_kernel,
        out_shape=jax.ShapeDtypeStruct((1, 1), jnp.float32),
        in_specs=[
            pl.BlockSpec(memory_space=pltpu.MemorySpace.VMEM),
            pl.BlockSpec(memory_space=pltpu.MemorySpace.VMEM),
        ],
        out_specs=pl.BlockSpec(memory_space=pltpu.MemorySpace.SMEM),
    )(w2, l2)
    return jnp.squeeze(out)


@jax.custom_vjp
def dynamic_weight_forward(weights, losses):
    """weights: (num_tasks,) trainable parameter; losses: (num_tasks,) vector.
    Returns scalar: sum(softmax(weights) * losses)."""
    return _forward_impl(weights, losses)


def _dw_fwd(weights, losses):
    out = _forward_impl(weights, losses)
    return out, (weights, losses, out)


def _dw_bwd(res, g):
    # Backward in plain jnp (a second pallas_call would double the dominant
    # launch/DMA cost).  Exact softmax here — gradient precision is not limited
    # by the forward's approx reciprocal.
    weights, losses, out = res
    p = jax.nn.softmax(weights.astype(jnp.float32))
    dw = g * p * (losses.astype(jnp.float32) - out)
    dl = g * p
    return dw.astype(weights.dtype), dl.astype(losses.dtype)


dynamic_weight_forward.defvjp(_dw_fwd, _dw_bwd)


if __name__ == "__main__":
    num_tasks = 3

    # Parameter init exactly as in the module: nn.Parameter(torch.ones(num_tasks))
    weights = jnp.ones((num_tasks,), dtype=jnp.float32)

    # Synthetic scalar losses (the module's forward receives a list of losses,
    # which torch.stack turns into a (num_tasks,) vector).
    key = jax.random.PRNGKey(0)
    losses = jax.random.uniform(key, (num_tasks,), dtype=jnp.float32) * 5.0

    # Forward.
    result = dynamic_weight_forward(weights, losses)
    result = jax.block_until_ready(result)

    ref_fn = lambda w, l: jnp.sum(jax.nn.softmax(w) * l)
    ref = ref_fn(weights, losses)
    assert jnp.allclose(result, ref, rtol=1e-4, atol=1e-4), (result, ref)

    # Backward (custom_vjp) vs. plain-JAX reference gradients.
    gw, gl = jax.grad(dynamic_weight_forward, argnums=(0, 1))(weights, losses)
    gw_ref, gl_ref = jax.grad(ref_fn, argnums=(0, 1))(weights, losses)
    gw, gl = jax.block_until_ready((gw, gl))
    assert jnp.allclose(gw, gw_ref, rtol=1e-4, atol=1e-4), (gw, gw_ref)
    assert jnp.allclose(gl, gl_ref, rtol=1e-4, atol=1e-4), (gl, gl_ref)

    print("KERNEL_OK")
</pallas_src>

<mosaic_0001>
module attributes {stable_mosaic.version = 11 : i64} {
  func.func @_dynamic_weight_kernel(%arg0: memref<1x3xf32, #tpu.memory_space<vmem>>, %arg1: memref<1x3xf32, #tpu.memory_space<vmem>>, %arg2: memref<1x1xf32, #tpu.memory_space<smem>>) attributes {dimension_semantics = [], scalar_prefetch = 0 : i64, scratch_operands = 0 : i64, tpu.core_type = #tpu.core_type<tc>} {
    %c0 = arith.constant 0 : index
    %c0_0 = arith.constant 0 : index
    %0 = vector.load %arg0[%c0, %c0_0] : memref<1x3xf32, #tpu.memory_space<vmem>>, vector<1x3xf32>
    %c0_1 = arith.constant 0 : index
    %c0_2 = arith.constant 0 : index
    %1 = vector.load %arg1[%c0_1, %c0_2] : memref<1x3xf32, #tpu.memory_space<vmem>>, vector<1x3xf32>
    %cst = arith.constant dense<0xFF800000> : vector<1xf32>
    %2 = vector.multi_reduction <maximumf>, %0, %cst [1] : vector<1x3xf32> to vector<1xf32>
    %3 = vector.shape_cast %2 : vector<1xf32> to vector<1x1xf32>
    %4 = vector.broadcast %3 : vector<1x1xf32> to vector<1x3xf32>
    %5 = arith.subf %0, %4 : vector<1x3xf32>
    %6 = math.exp %5 : vector<1x3xf32>
    %7 = arith.mulf %6, %1 : vector<1x3xf32>
    %cst_3 = arith.constant dense<0.000000e+00> : vector<1xf32>
    %8 = vector.multi_reduction <add>, %7, %cst_3 [1] : vector<1x3xf32> to vector<1xf32>
    %9 = vector.shape_cast %8 : vector<1xf32> to vector<1x1xf32>
    %cst_4 = arith.constant dense<0.000000e+00> : vector<1xf32>
    %10 = vector.multi_reduction <add>, %6, %cst_4 [1] : vector<1x3xf32> to vector<1xf32>
    %11 = vector.shape_cast %10 : vector<1xf32> to vector<1x1xf32>
    %12 = tpu.reciprocal %11 {approx = true} : vector<1x1xf32> -> vector<1x1xf32>
    %13 = arith.mulf %9, %12 : vector<1x1xf32>
    %14 = vector.extract %13[0, 0] : f32 from vector<1x1xf32>
    %c0_5 = arith.constant 0 : index
    %c0_6 = arith.constant 0 : index
    %15 = memref.load %arg2[%c0_5, %c0_6] : memref<1x1xf32, #tpu.memory_space<smem>>
    memref.store %14, %arg2[%c0_5, %c0_6] : memref<1x1xf32, #tpu.memory_space<smem>>
    return
  }
}

</mosaic_0001>

<bundles_post_ra>
// kernel: tpu_custom_call.1
= control target key start
LH: loop header
LB: loop body
LE: loop exit
PB: predicated region body
PF: predicated region fallthrough
CT: control target
= control target key end

     0   :  { %7 = vsyncpa [#allocation3], 0  ;;  %s180_s0 = inlined_call_operand.hbm [shape: f32[1,3], index: 0, kind: input, shape index: {}]   ;;  %s181_s1 = inlined_call_operand.hbm [shape: f32[1,3], index: 1, kind: input, shape index: {}]   ;;  %s182_s2 = inlined_call_operand.hbm [shape: f32[1,1], index: 2, kind: output, shape index: {}]  }
   0x1   :  { %8 = vsyncpa [#allocation6], 0 }
   0x2   :  { %9 = vsyncpa [#allocation4], 0  ;;  %s15_s11 = sshll.u32 %s180_s0, 4  ;;  %s153_s12 = smov [#allocation2]   ;;  %s16_s11 = int_to_ptr.hbm [resolvable:$true] %s15_s11 }
   0x3   :  { %s17_s13 = sshll.u32 %s153_s12, 4  ;;  %s26_s16 = sshll.u32 %s181_s1, 4  ;;  %s18_s13 = int_to_ptr.vmem [resolvable:$true] %s17_s13  ;;  %s27_s16 = int_to_ptr.hbm [resolvable:$true] %s26_s16 }
   0x4   :  { %20 = dma.hbm_to_vmem [thread:$0]  %s16_s11, 16, %s18_s13, [#allocation3]  }
   0x5   :  { %s154_s17 = smov [#allocation5]  }
   0x6   :  { %s28_s18 = sshll.u32 %s154_s17, 4  ;;  %s29_s18 = int_to_ptr.vmem [resolvable:$true] %s28_s18 }
   0x7   :  { %31 = dma.hbm_to_vmem [thread:$0]  %s27_s16, 16, %s29_s18, [#allocation6]  }
   0x8   :  { %147 = dma.done.wait [#allocation3], 16  }
   0x9   :  { %148 = vsyncadd [#allocation3], 4294967280 }
   0xa   :  { %149 = dma.done.wait [#allocation6], 16  }
   0xb   :  { %150 = vsyncadd [#allocation6], 4294967280  ;;  %vm42_vm0 = vcmask 16384   ;;  %v40_v0 = vld [vmem:[#allocation2] sm:$0x1]  ;;  %s66_s19 = sshll.u32 %s182_s2, 4  ;;  %s67_s19 = int_to_ptr.hbm [resolvable:$true] %s66_s19 }
   0xc   :  { %v43_v1 = vsel %vm42_vm0, %v40_v0, -inf  ;;  %v41_v5 = vld [vmem:[#allocation5] sm:$0x1]  ;;  %s155_s21 = smov [#allocation7]  }
   0xd   :  { %44 = vmax.xlane.f32.xlu0 %v43_v1 }
  0x80   :  { %v45_v2 = vpop.xlane.xlu0 %44 }
  0x81   :  { %v46_v3 = vsub.f32 %v40_v0, %v45_v2 }
  0x83   :  { %v47_v4 = vmul.f32 1.442695, %v46_v3 }
  0x85   :  { %83 = vpow2.f32 %v47_v4 }
  0x8b   :  { %v84_v6 = vpop.eup %83 }
  0x8c   :  { %v53_v7 = vsel %vm42_vm0, %v84_v6, 0.0  ;;  %v49_v8 = vmul.f32 %v84_v6, %v41_v5 }
  0x8d   :  { %54 = vadd.xlane.f32.xlu0 %v53_v7 }
  0x8e   :  { %v50_v9 = vsel %vm42_vm0, %v49_v8, 0.0 }
  0x8f   :  { %51 = vadd.xlane.f32.xlu1 %v50_v9 }
 0x100   :  { %v55_v10 = vpop.xlane.xlu0 %54 }
 0x101   :  { %85 = vrcp.f32 %v55_v10 }
 0x102   :  { %v52_v12 = vpop.xlane.xlu1 %51 }
 0x107   :  { %v86_v11 = vpop.eup %85 }
 0x108   :  { %v57_v13 = vmul.f32 %v86_v11, %v52_v12 }
 0x10a   :  { %78 = vpush %v57_v13 }
 0x13b   :  { %s79_s20 = spop %78 }
 0x13c   :  { %60 = sst [smem:[#allocation7]] %s79_s20 }
 0x13d   :  { %69 = dma.smem_to_hbm %s155_s21, 16, %s67_s19, [#allocation4]  }
 0x13e   :  { %151 = dma.done.wait [#allocation4], 16  }
 0x13f   :  { %152 = vsyncadd [#allocation4], 4294967280 }
 0x140   :  { %74 = sfence }
 0x141   :  { %75 = vsyncpa [#allocation3], 1 }
 0x142   :  { %76 = vsyncpa [#allocation6], 1 }
 0x143   :  { %77 = vsyncpa [#allocation4], 1 }

</bundles_post_ra>
